<compile_context>
chip_gen: v7x
topology: tpu7x:2x2x1
jax: 0.10.0
libtpu: 0.0.40
codegen_flags: <defaults>
</compile_context>

<pallas_src>
import functools

import jax
import jax.numpy as jnp
from jax.experimental import pallas as pl
from jax.experimental.pallas import tpu as pltpu


def _cdiv(a, b):
    return -(-a // b)


def _round_up(x, m):
    return _cdiv(x, m) * m


def _choose_tiles(L, d, itemsize):
    """Byte-budgeted tiles: (TI, TJ, TD) for an output block (TI, TJ, TD)."""
    # Lane (minormost) tile: keep full d unless it is large and cleanly
    # divisible -- every store stays wide / unmasked either way.
    if d > 512 and d % 512 == 0:
        TD = 512
    else:
        TD = d
    # j tile (sublane dim of the output block): full L when cheap, else a
    # multiple of 8 keeping one j-slab around ~512 KiB.
    max_tj = max(8, (512 * 1024) // max(1, TD * itemsize))
    if max_tj >= L:
        TJ = L
    else:
        TJ = max(8, (max_tj // 8) * 8)
    # i tile (leading dim): multiple of 8 so the band-window start stays
    # sublane-aligned; sized so each output block is ~2 MiB, capped at 64 rows
    # (static unroll length) and so the i axis keeps >= 2 blocks when possible
    # (v7x megacore split).
    target = 2 * 1024 * 1024
    ti = target // max(1, TJ * TD * itemsize)
    TI = max(8, min(64, (ti // 8) * 8))
    if L >= 16:
        TI = min(TI, max(8, ((L // 2) // 8) * 8))
    TI = min(TI, _round_up(L, 8))
    return TI, TJ, TD


def _expand_kernel(band_ref, o_ref, *, TI, TJ, Lip, width):
    """out[i0+a, j0+b, :] = band[(j0+b) - (i0+a) + (Lip-1), :].

    band_ref : (K_pad, TD) VMEM-resident diagonal band (plus padding rows)
    o_ref    : (TI, TJ, TD) output tile
    """
    bi = pl.program_id(1)
    bj = pl.program_id(2)
    # Band window covering every (a, b) of this tile.  start is a multiple of 8
    # by construction (TI, Lip are multiples of 8; TJ is a multiple of 8 unless
    # there is a single j block, in which case bj == 0), so this dynamic
    # sublane slice is aligned.
    start = bj * TJ - bi * TI + (Lip - TI)
    start = pl.multiple_of(start, 8)
    w = band_ref[pl.ds(start, width), :]              # (width, TD)
    for a in range(TI):                               # static unroll, TI <= 64
        s = TI - 1 - a
        o_ref[a, :, :] = w[s:s + TJ, :]               # contiguous window copy


def relative_position_embedding(table, seq_len, max_len):
    """table: [2*max_len - 1, d_model] -> [seq_len, seq_len, d_model]."""
    V, d = table.shape
    assert V == 2 * max_len - 1
    L = int(seq_len)
    itemsize = jnp.dtype(table.dtype).itemsize

    TI, TJ, TD = _choose_tiles(L, d, itemsize)
    nI, nJ, nD = _cdiv(L, TI), _cdiv(L, TJ), _cdiv(d, TD)
    Lip, Ljp = nI * TI, nJ * TJ
    width = _round_up(TI + TJ - 1, 8)                     # band window rows
    K_pad = _round_up((Lip - TI) + (Ljp - TJ) + width, 8)  # band rows (padded)

    # Diagonal band: band[k] = table[clip(k - (Lip-1), -(M-1), M-1) + M-1].
    # Only O(L) distinct output rows exist, so this O(L*d) slab is all the
    # kernel ever reads.  (The row lookup itself is a tiny wrapper-side gather;
    # the L^2*d expansion -- the actual cost -- happens in the kernel.)
    k = jnp.arange(K_pad, dtype=jnp.int32)
    idx = jnp.clip(k - (Lip - 1), -(max_len - 1), max_len - 1) + (max_len - 1)
    band = jnp.take(table, idx, axis=0)                   # (K_pad, d)

    kernel = functools.partial(
        _expand_kernel, TI=TI, TJ=TJ, Lip=Lip, width=width)

    # Memory-bound op: ~zero flops, bytes = output writeback + band read.
    cost = pl.CostEstimate(
        flops=0,
        transcendentals=0,
        bytes_accessed=(L * L * d + nD * K_pad * d) * itemsize,
    )

    out = pl.pallas_call(
        kernel,
        out_shape=jax.ShapeDtypeStruct((L, L, d), table.dtype),
        grid_spec=pltpu.PrefetchScalarGridSpec(
            num_scalar_prefetch=0,
            grid=(nD, nI, nJ),
            in_specs=[
                # Band stays VMEM-resident; its block index only changes with
                # the outermost (d-tile) axis, so it is fetched nD times total.
                pl.BlockSpec((K_pad, TD), lambda kd, bi, bj: (0, kd)),
            ],
            out_specs=pl.BlockSpec(
                (TI, TJ, TD), lambda kd, bi, bj: (bi, bj, kd)),
        ),
        compiler_params=pltpu.CompilerParams(
            dimension_semantics=("parallel", "parallel", "parallel"),
            # >= default on v6e/v7x, raises v5e's 16 MiB default; tiles above
            # are budgeted to stay well under this on every chip.
            vmem_limit_bytes=32 * 1024 * 1024,
        ),
        cost_estimate=cost,
    )(band)

    return out


def init_table(key, d_model, max_len, dtype=jnp.float32):
    """Mimics nn.Embedding default init (standard normal)."""
    return jax.random.normal(key, (2 * max_len - 1, d_model), dtype)


if __name__ == "__main__":
    key = jax.random.PRNGKey(0)
    # seq_len > max_len so the clamp path is actually exercised;
    # d_model = 128 keeps the output lane-dense.
    d_model, max_len, seq_len = 128, 6, 8

    table = init_table(key, d_model, max_len)

    out = relative_position_embedding(table, seq_len, max_len)
    out = jax.block_until_ready(out)

    # Pure-JAX reference mirroring the PyTorch forward.
    rv = jnp.arange(seq_len)
    dist = rv[None, :] - rv[:, None]
    idx = jnp.clip(dist, -(max_len - 1), max_len - 1) + max_len - 1
    ref = table[idx]

    assert out.shape == (seq_len, seq_len, d_model)
    # Kernel is a pure copy/broadcast -> bit-exact (no matmul rounding).
    assert bool(jnp.array_equal(out, ref))

    print("KERNEL_OK")
</pallas_src>

<mosaic_0001>
module attributes {stable_mosaic.version = 11 : i64} {
  func.func @_expand_kernel(%arg0: i32, %arg1: i32, %arg2: i32, %arg3: memref<16x128xf32, #tpu.memory_space<vmem>>, %arg4: memref<8x8x128xf32, #tpu.memory_space<vmem>>) attributes {dimension_semantics = [#tpu.dimension_semantics<parallel>, #tpu.dimension_semantics<parallel>, #tpu.dimension_semantics<parallel>], iteration_bounds = array<i64: 1, 1, 1>, scalar_prefetch = 0 : i64, scratch_operands = 0 : i64, tpu.core_type = #tpu.core_type<tc>, window_params = [{transform_indices = @transform_0, window_bounds = array<i64: 16, 128>}, {transform_indices = @transform_1, window_bounds = array<i64: 8, 8, 128>}]} {
    %c8_i32 = arith.constant 8 : i32
    %0 = arith.muli %arg2, %c8_i32 : i32
    %c8_i32_0 = arith.constant 8 : i32
    %1 = arith.muli %arg1, %c8_i32_0 : i32
    %2 = arith.subi %0, %1 : i32
    %c0_i32 = arith.constant 0 : i32
    %3 = arith.addi %2, %c0_i32 : i32
    %4 = tpu.assume_multiple %3, 8 : i32
    %5 = arith.index_cast %4 : i32 to index
    %c0 = arith.constant 0 : index
    %6 = vector.load %arg3[%5, %c0] : memref<16x128xf32, #tpu.memory_space<vmem>>, vector<16x128xf32>
    %7 = vector.extract_strided_slice %6 {offsets = [7, 0], sizes = [8, 128], strides = [1, 1]} : vector<16x128xf32> to vector<8x128xf32>
    %c0_1 = arith.constant 0 : index
    %c0_2 = arith.constant 0 : index
    %c0_3 = arith.constant 0 : index
    %8 = vector.load %arg4[%c0_1, %c0_2, %c0_3] : memref<8x8x128xf32, #tpu.memory_space<vmem>>, vector<1x8x128xf32>
    %9 = vector.shape_cast %8 : vector<1x8x128xf32> to vector<8x128xf32>
    %10 = vector.shape_cast %7 : vector<8x128xf32> to vector<1x8x128xf32>
    tpu.vector_store %arg4[%c0_1, %c0_2, %c0_3], %10 {strides = array<i32>} : memref<8x8x128xf32, #tpu.memory_space<vmem>>, vector<1x8x128xf32>,
    %11 = vector.extract_strided_slice %6 {offsets = [6, 0], sizes = [8, 128], strides = [1, 1]} : vector<16x128xf32> to vector<8x128xf32>
    %c1 = arith.constant 1 : index
    %c0_4 = arith.constant 0 : index
    %c0_5 = arith.constant 0 : index
    %12 = vector.load %arg4[%c1, %c0_4, %c0_5] : memref<8x8x128xf32, #tpu.memory_space<vmem>>, vector<1x8x128xf32>
    %13 = vector.shape_cast %12 : vector<1x8x128xf32> to vector<8x128xf32>
    %14 = vector.shape_cast %11 : vector<8x128xf32> to vector<1x8x128xf32>
    tpu.vector_store %arg4[%c1, %c0_4, %c0_5], %14 {strides = array<i32>} : memref<8x8x128xf32, #tpu.memory_space<vmem>>, vector<1x8x128xf32>,
    %15 = vector.extract_strided_slice %6 {offsets = [5, 0], sizes = [8, 128], strides = [1, 1]} : vector<16x128xf32> to vector<8x128xf32>
    %c2 = arith.constant 2 : index
    %c0_6 = arith.constant 0 : index
    %c0_7 = arith.constant 0 : index
    %16 = vector.load %arg4[%c2, %c0_6, %c0_7] : memref<8x8x128xf32, #tpu.memory_space<vmem>>, vector<1x8x128xf32>
    %17 = vector.shape_cast %16 : vector<1x8x128xf32> to vector<8x128xf32>
    %18 = vector.shape_cast %15 : vector<8x128xf32> to vector<1x8x128xf32>
    tpu.vector_store %arg4[%c2, %c0_6, %c0_7], %18 {strides = array<i32>} : memref<8x8x128xf32, #tpu.memory_space<vmem>>, vector<1x8x128xf32>,
    %19 = vector.extract_strided_slice %6 {offsets = [4, 0], sizes = [8, 128], strides = [1, 1]} : vector<16x128xf32> to vector<8x128xf32>
    %c3 = arith.constant 3 : index
    %c0_8 = arith.constant 0 : index
    %c0_9 = arith.constant 0 : index
    %20 = vector.load %arg4[%c3, %c0_8, %c0_9] : memref<8x8x128xf32, #tpu.memory_space<vmem>>, vector<1x8x128xf32>
    %21 = vector.shape_cast %20 : vector<1x8x128xf32> to vector<8x128xf32>
    %22 = vector.shape_cast %19 : vector<8x128xf32> to vector<1x8x128xf32>
    tpu.vector_store %arg4[%c3, %c0_8, %c0_9], %22 {strides = array<i32>} : memref<8x8x128xf32, #tpu.memory_space<vmem>>, vector<1x8x128xf32>,
    %23 = vector.extract_strided_slice %6 {offsets = [3, 0], sizes = [8, 128], strides = [1, 1]} : vector<16x128xf32> to vector<8x128xf32>
    %c4 = arith.constant 4 : index
    %c0_10 = arith.constant 0 : index
    %c0_11 = arith.constant 0 : index
    %24 = vector.load %arg4[%c4, %c0_10, %c0_11] : memref<8x8x128xf32, #tpu.memory_space<vmem>>, vector<1x8x128xf32>
    %25 = vector.shape_cast %24 : vector<1x8x128xf32> to vector<8x128xf32>
    %26 = vector.shape_cast %23 : vector<8x128xf32> to vector<1x8x128xf32>
    tpu.vector_store %arg4[%c4, %c0_10, %c0_11], %26 {strides = array<i32>} : memref<8x8x128xf32, #tpu.memory_space<vmem>>, vector<1x8x128xf32>,
    %27 = vector.extract_strided_slice %6 {offsets = [2, 0], sizes = [8, 128], strides = [1, 1]} : vector<16x128xf32> to vector<8x128xf32>
    %c5 = arith.constant 5 : index
    %c0_12 = arith.constant 0 : index
    %c0_13 = arith.constant 0 : index
    %28 = vector.load %arg4[%c5, %c0_12, %c0_13] : memref<8x8x128xf32, #tpu.memory_space<vmem>>, vector<1x8x128xf32>
    %29 = vector.shape_cast %28 : vector<1x8x128xf32> to vector<8x128xf32>
    %30 = vector.shape_cast %27 : vector<8x128xf32> to vector<1x8x128xf32>
    tpu.vector_store %arg4[%c5, %c0_12, %c0_13], %30 {strides = array<i32>} : memref<8x8x128xf32, #tpu.memory_space<vmem>>, vector<1x8x128xf32>,
    %31 = vector.extract_strided_slice %6 {offsets = [1, 0], sizes = [8, 128], strides = [1, 1]} : vector<16x128xf32> to vector<8x128xf32>
    %c6 = arith.constant 6 : index
    %c0_14 = arith.constant 0 : index
    %c0_15 = arith.constant 0 : index
    %32 = vector.load %arg4[%c6, %c0_14, %c0_15] : memref<8x8x128xf32, #tpu.memory_space<vmem>>, vector<1x8x128xf32>
    %33 = vector.shape_cast %32 : vector<1x8x128xf32> to vector<8x128xf32>
    %34 = vector.shape_cast %31 : vector<8x128xf32> to vector<1x8x128xf32>
    tpu.vector_store %arg4[%c6, %c0_14, %c0_15], %34 {strides = array<i32>} : memref<8x8x128xf32, #tpu.memory_space<vmem>>, vector<1x8x128xf32>,
    %35 = vector.extract_strided_slice %6 {offsets = [0, 0], sizes = [8, 128], strides = [1, 1]} : vector<16x128xf32> to vector<8x128xf32>
    %c7 = arith.constant 7 : index
    %c0_16 = arith.constant 0 : index
    %c0_17 = arith.constant 0 : index
    %36 = vector.load %arg4[%c7, %c0_16, %c0_17] : memref<8x8x128xf32, #tpu.memory_space<vmem>>, vector<1x8x128xf32>
    %37 = vector.shape_cast %36 : vector<1x8x128xf32> to vector<8x128xf32>
    %38 = vector.shape_cast %35 : vector<8x128xf32> to vector<1x8x128xf32>
    tpu.vector_store %arg4[%c7, %c0_16, %c0_17], %38 {strides = array<i32>} : memref<8x8x128xf32, #tpu.memory_space<vmem>>, vector<1x8x128xf32>,
    return
  }
  func.func @transform_0(%arg0: i32, %arg1: i32, %arg2: i32) -> (i32, i32) {
    %c0_i32 = arith.constant 0 : i32
    %c0_i32_0 = arith.constant 0 : i32
    return %c0_i32, %arg0 : i32, i32
  }
  func.func @transform_1(%arg0: i32, %arg1: i32, %arg2: i32) -> (i32, i32, i32) {
    %c0_i32 = arith.constant 0 : i32
    return %arg1, %arg2, %arg0 : i32, i32, i32
  }
}

</mosaic_0001>

<bundles_post_ra>
// kernel: tpu_custom_call.1
= control target key start
LH: loop header
LB: loop body
LE: loop exit
PB: predicated region body
PF: predicated region fallthrough
CT: control target
= control target key end

     0   :  { %6 = vsyncpa [#allocation3], 0  ;;  %s172_s0 = inlined_call_operand.hbm [shape: f32[16,128], index: 0, kind: input, shape index: {}]   ;;  %s173_s1 = inlined_call_operand.hbm [shape: f32[8,8,128], index: 1, kind: output, shape index: {}]  }
   0x1   :  { %7 = vsyncpa [#allocation4], 0  ;;  %s121_s6 = smov [#allocation2]   ;;  %s73_s10 = scalar_lea.hbm %s172_s0, 256 }
   0x2   :  { %s13_s7 = sshll.u32 %s121_s6, 4  ;;  %p74_p0 = scmp.ne.s32.totalorder %s172_s0, %s73_s10  ;;  %s14_s7 = int_to_ptr.vmem [resolvable:$true] %s13_s7 }
   0x3   :  { %p77_p1 = scmp.lt.u32.totalorder %s73_s10, %s172_s0 }
   0x5   :  { %p79_p2 = pnand %p77_p1, %p74_p0 }
   0x7   :  { %82 = shalt.err (!%p79_p2)
}
   0x8   :  { %s83_s15 = scalar_lea.vmem %s14_s7, 256  ;;  %p88_p4 = scmp.lt.s32.totalorder %s14_s7, %s14_s7 }
   0x9   :  { %p84_p3 = scmp.ne.s32.totalorder %s14_s7, %s83_s15  ;;  %p89_p5 = scmp.lt.s32.totalorder %s83_s15, %s83_s15 }
   0xb   :  { %p90_p6 = por %p89_p5, %p88_p4 }
   0xd   :  { %p91_p7 = pnand %p90_p6, %p84_p3 }
   0xf   :  { %94 = shalt.err (!%p91_p7)
}
  0x10   :  { %s122_s16 = smov 128   ;;  %s123_s17 = smov 8  }
  0x11   :  { %19 = dma.hbm_to_vmem [thread:$0]  %s172_s0, 256, %s14_s7, [#allocation3], %s122_s16, %s122_s16, %s123_s17  }
  0x12   :  { %117 = dma.done.wait [#allocation3], 256  }
  0x13   :  { %118 = vsyncadd [#allocation3], 4294967040  ;;  %s124_s20 = smov [#allocation5]   ;;  %v27_v0 = vld [vmem:[#allocation2] sm:$0xff]  ;;  %v28_v1 = vld [vmem:[#allocation2 + $0x8] sm:$0xff] }
  0x14   :  { %s56_s21 = sshll.u32 %s124_s20, 4  ;;  %29 = vst [vmem:[#allocation5 - $0x7] sm:$0x80] %v27_v0  ;;  %32 = vst [vmem:[#allocation5 + $0x2] sm:$0xc0] %v27_v0  ;;  %s150_s21 = int_to_ptr.vmem [resolvable:$true] %s56_s21 }
  0x15   :  { %35 = vst [vmem:[#allocation5 + $0xb] sm:$0xe0] %v27_v0  ;;  %38 = vst [vmem:[#allocation5 + $0x14] sm:$0xf0] %v27_v0  ;;  %s95_s0 = scalar_lea.vmem %s150_s21, 1024  ;;  %p100_p9 = scmp.lt.s32.totalorder %s150_s21, %s150_s21 }
  0x16   :  { %41 = vst [vmem:[#allocation5 + $0x1d] sm:$0xf8] %v27_v0  ;;  %44 = vst [vmem:[#allocation5 + $0x26] sm:$0xfc] %v27_v0  ;;  %p96_p8 = scmp.ne.s32.totalorder %s150_s21, %s95_s0  ;;  %p101_p10 = scmp.lt.s32.totalorder %s95_s0, %s95_s0 }
  0x17   :  { %47 = vst [vmem:[#allocation5 + $0x2f] sm:$0xfe] %v27_v0  ;;  %50 = vst [vmem:[#allocation5 + $0x38] sm:$0xff] %v27_v0 }
  0x18   :  { %30 = vst [vmem:[#allocation5 + $0x1] sm:$0x7f] %v28_v1  ;;  %33 = vst [vmem:[#allocation5 + $0xa] sm:$0x3f] %v28_v1  ;;  %p102_p11 = por %p101_p10, %p100_p9 }
  0x19   :  { %36 = vst [vmem:[#allocation5 + $0x13] sm:$0x1f] %v28_v1  ;;  %39 = vst [vmem:[#allocation5 + $0x1c] sm:$0xf] %v28_v1 }
  0x1a   :  { %42 = vst [vmem:[#allocation5 + $0x25] sm:$0x7] %v28_v1  ;;  %45 = vst [vmem:[#allocation5 + $0x2e] sm:$0x3] %v28_v1  ;;  %p103_p12 = pnand %p102_p11, %p96_p8 }
  0x1b   :  { %48 = vst [vmem:[#allocation5 + $0x37] sm:$0x1] %v28_v1 }
  0x1c   :  { %106 = shalt.err (!%p103_p12)
}
  0x1d   :  { %s107_s24 = scalar_lea.hbm %s173_s1, 1024 }
  0x1e   :  { %p108_p13 = scmp.ne.s32.totalorder %s173_s1, %s107_s24  ;;  %p111_p0 = scmp.lt.u32.totalorder %s107_s24, %s173_s1 }
  0x20   :  { %p113_p1 = pnand %p111_p0, %p108_p13 }
  0x22   :  { %116 = shalt.err (!%p113_p1)
}
  0x23   :  { %62 = dma.vmem_to_hbm [thread:$0]  %s150_s21, 1024, %s173_s1, [#allocation4], %s122_s16, %s122_s16, %s123_s17  }
  0x24   :  { %119 = dma.done.wait [#allocation4], 1024  }
  0x25   :  { %120 = vsyncadd [#allocation4], 4294966272 }
  0x26   :  { %66 = vsyncpa [#allocation3], 1 }
  0x27   :  { %67 = vsyncpa [#allocation4], 1 }

</bundles_post_ra>
